<compile_context>
chip_gen: v6e
topology: v6e:2x2x1
jax: 0.10.0
libtpu: 0.0.40
codegen_flags: <defaults>
</compile_context>

<pallas_src>
import functools

import jax
import jax.numpy as jnp
from jax import lax
from jax.experimental import pallas as pl
from jax.experimental.pallas import tpu as pltpu


def _round_up(x, m):
    return -(-x // m) * m


# ---------------------------------------------------------------------------
# Kernels
# ---------------------------------------------------------------------------
def _lsce_partial_kernel(n_rows, tile_rows, logits_ref, tgt_ref, part_ref):
    """One grid step: a (tile_rows, C) tile of logits -> (1, 8, 128) partials.

    part[0, 0, 0] = sum_rows( -sum_c log_softmax(x) )      ("loss" term)
    part[0, 0, 1] = sum_rows( -log_softmax(x)[target] )    ("nll" term)
    Everything else is zero; the wrapper sums partials across tiles.
    """
    i = pl.program_id(0)

    x = logits_ref[...].astype(jnp.float32)                     # (TM, C)
    c = x.shape[-1]

    # log-sum-exp along the class (lane) axis.
    m = jnp.max(x, axis=-1, keepdims=True)                      # (TM, 1)
    lse = m + jnp.log(jnp.sum(jnp.exp(x - m), axis=-1, keepdims=True))

    sum_x = jnp.sum(x, axis=-1, keepdims=True)                  # (TM, 1)

    # x[row, target[row]] via a one-hot mask on the raw logits.
    cls_idx = lax.broadcasted_iota(jnp.int32, x.shape, 1)       # (TM, C)
    tgt = tgt_ref[...]                                          # (TM, 1) int32
    x_at_t = jnp.sum(jnp.where(cls_idx == tgt, x, 0.0),
                     axis=-1, keepdims=True)                    # (TM, 1)

    row_neg_sum = c * lse - sum_x                                # -sum_c logp
    nll_row = lse - x_at_t                                       # -logp[target]

    # Mask rows introduced by the wrapper's zero padding of N.
    row_id = i * tile_rows + lax.broadcasted_iota(
        jnp.int32, (tile_rows, 1), 0)                            # (TM, 1)
    valid = (row_id < n_rows).astype(jnp.float32)

    loss_part = jnp.sum(row_neg_sum * valid)
    nll_part = jnp.sum(nll_row * valid)

    sub = lax.broadcasted_iota(jnp.int32, part_ref.shape, 1)
    lane = lax.broadcasted_iota(jnp.int32, part_ref.shape, 2)
    part_ref[...] = jnp.where((sub == 0) & (lane == 0), loss_part,
                              jnp.where((sub == 0) & (lane == 1), nll_part, 0.0))


def _lsce_rowwise_kernel(eps, logits_ref, tgt_ref, out_ref):
    """Per-row loss (reduction='none'); result broadcast across 128 lanes."""
    x = logits_ref[...].astype(jnp.float32)                     # (TM, C)
    c = x.shape[-1]

    m = jnp.max(x, axis=-1, keepdims=True)
    lse = m + jnp.log(jnp.sum(jnp.exp(x - m), axis=-1, keepdims=True))
    sum_x = jnp.sum(x, axis=-1, keepdims=True)

    cls_idx = lax.broadcasted_iota(jnp.int32, x.shape, 1)
    tgt = tgt_ref[...]
    x_at_t = jnp.sum(jnp.where(cls_idx == tgt, x, 0.0), axis=-1, keepdims=True)

    row_loss = eps * ((c * lse - sum_x) / c) + (1.0 - eps) * (lse - x_at_t)
    out_ref[...] = jnp.broadcast_to(row_loss, out_ref.shape)    # (TM, 128)


# ---------------------------------------------------------------------------
# Tiling heuristics
# ---------------------------------------------------------------------------
def _pick_tile(n, c, logits_dtype):
    """Generation-aware row tile + VMEM limit (v5e/v6e: 128 MiB, v7x: 64 MiB)."""
    try:
        vmem_bytes = int(pltpu.get_tpu_info().vmem_capacity_bytes)
    except Exception:
        vmem_bytes = 64 * 1024 * 1024        # conservative default (v7x per-TC)
    budget = vmem_bytes // 4                 # headroom for pipelining / scratch
    c_lanes = _round_up(c, 128)
    itemsize = jnp.dtype(logits_dtype).itemsize
    per_row = (2 * c_lanes * itemsize        # double-buffered logits tile
               + 2 * 128 * 4                 # double-buffered (lane-padded) target
               + 3 * c_lanes * 4)            # in-kernel f32 temporaries
    tile = budget // max(per_row, 1)
    tile = max(8, min(1024, (tile // 8) * 8))
    tile = min(tile, max(8, _round_up(n, 8)))   # don't over-allocate for tiny N
    vmem_limit = int(min(vmem_bytes * 3 // 4,
                         max(32 << 20, per_row * tile + (4 << 20))))
    return tile, vmem_limit


# ---------------------------------------------------------------------------
# Wrapper
# ---------------------------------------------------------------------------
@functools.partial(jax.jit,
                   static_argnames=("eps", "reduction", "tile_rows", "vmem_limit"))
def _lsce_impl(output, target, *, eps, reduction, tile_rows, vmem_limit):
    n, c = output.shape
    n_pad = _round_up(n, tile_rows)
    if n_pad != n:
        output = jnp.pad(output, ((0, n_pad - n), (0, 0)))
        target = jnp.pad(target, (0, n_pad - n))
    tgt2d = target.astype(jnp.int32).reshape(n_pad, 1)
    num_tiles = n_pad // tile_rows

    cparams = pltpu.CompilerParams(dimension_semantics=("parallel",),
                                   vmem_limit_bytes=vmem_limit)

    if reduction == "none":
        rows = pl.pallas_call(
            functools.partial(_lsce_rowwise_kernel, eps),
            out_shape=jax.ShapeDtypeStruct((n_pad, 128), jnp.float32),
            grid=(num_tiles,),
            in_specs=[
                pl.BlockSpec((tile_rows, c), lambda i: (i, 0)),
                pl.BlockSpec((tile_rows, 1), lambda i: (i, 0)),
            ],
            out_specs=pl.BlockSpec((tile_rows, 128), lambda i: (i, 0)),
            compiler_params=cparams,
        )(output, tgt2d)
        return rows[:n, 0]

    partials = pl.pallas_call(
        functools.partial(_lsce_partial_kernel, n, tile_rows),
        out_shape=jax.ShapeDtypeStruct((num_tiles, 8, 128), jnp.float32),
        grid=(num_tiles,),
        in_specs=[
            pl.BlockSpec((tile_rows, c), lambda i: (i, 0)),
            pl.BlockSpec((tile_rows, 1), lambda i: (i, 0)),
        ],
        out_specs=pl.BlockSpec((1, 8, 128), lambda i: (i, 0, 0)),
        compiler_params=cparams,
    )(output, tgt2d)

    loss_sum = jnp.sum(partials[..., 0])
    nll_sum = jnp.sum(partials[..., 1])

    if reduction == "mean":
        loss = loss_sum / n
        nll = nll_sum / n
    else:  # "sum"
        loss = loss_sum
        nll = nll_sum

    return eps * (loss / c) + (1.0 - eps) * nll


def label_smoothing_cross_entropy(output, target, *, eps=0.1,
                                  reduction="mean", tile_rows=None):
    """output: (N, C) float logits, target: (N,) int labels.

    reduction: 'mean' / 'sum' -> scalar;  'none' (or None) -> per-row (N,).
    """
    # TODO(synk): PyTorch's reduce_loss treats any unknown reduction as
    # "no reduction"; here None is mapped to the explicit 'none' path.
    if reduction is None:
        reduction = "none"
    if reduction not in ("mean", "sum", "none"):
        raise ValueError(f"unsupported reduction: {reduction!r}")
    n, c = output.shape
    if tile_rows is None:
        tile_rows, vmem_limit = _pick_tile(n, c, output.dtype)
    else:
        _, vmem_limit = _pick_tile(n, c, output.dtype)
        tile_rows = max(8, (int(tile_rows) // 8) * 8)
    return _lsce_impl(output, target, eps=float(eps), reduction=reduction,
                      tile_rows=int(tile_rows), vmem_limit=int(vmem_limit))


# ---------------------------------------------------------------------------
# Reference + self-test
# ---------------------------------------------------------------------------
def _reference(output, target, eps=0.1, reduction="mean"):
    c = output.shape[-1]
    logp = jax.nn.log_softmax(output.astype(jnp.float32), axis=-1)
    row_loss = -jnp.sum(logp, axis=-1)
    row_nll = -jnp.take_along_axis(
        logp, target[:, None].astype(jnp.int32), axis=-1)[:, 0]
    if reduction == "mean":
        loss, nll = row_loss.mean(), row_nll.mean()
    elif reduction == "sum":
        loss, nll = row_loss.sum(), row_nll.sum()
    else:
        loss, nll = row_loss, row_nll
    return eps * (loss / c) + (1.0 - eps) * nll


if __name__ == "__main__":
    key = jax.random.PRNGKey(0)
    k1, k2, k3, k4 = jax.random.split(key, 4)

    # Case 1: tile-aligned batch, 'mean'.
    N, C = 16, 32
    output = jax.random.normal(k1, (N, C), dtype=jnp.float32)
    target = jax.random.randint(k2, (N,), 0, C, dtype=jnp.int32)
    res = jax.block_until_ready(
        label_smoothing_cross_entropy(output, target, eps=0.1, reduction="mean"))
    ref = _reference(output, target, eps=0.1, reduction="mean")
    assert jnp.allclose(res, ref, rtol=1e-5, atol=1e-5), (res, ref)

    # Case 2: ragged batch (zero-padding + in-kernel row masking), 'mean'.
    N2, C2 = 13, 40
    output2 = jax.random.normal(k3, (N2, C2), dtype=jnp.float32)
    target2 = jax.random.randint(k4, (N2,), 0, C2, dtype=jnp.int32)
    res2 = jax.block_until_ready(
        label_smoothing_cross_entropy(output2, target2, eps=0.1, reduction="mean"))
    ref2 = _reference(output2, target2, eps=0.1, reduction="mean")
    assert jnp.allclose(res2, ref2, rtol=1e-5, atol=1e-5), (res2, ref2)

    # Case 3: 'sum' reduction.
    res3 = jax.block_until_ready(
        label_smoothing_cross_entropy(output, target, eps=0.1, reduction="sum"))
    ref3 = _reference(output, target, eps=0.1, reduction="sum")
    assert jnp.allclose(res3, ref3, rtol=1e-5, atol=1e-4), (res3, ref3)

    # Case 4: 'none' reduction (per-row loss) on the ragged batch.
    res4 = jax.block_until_ready(
        label_smoothing_cross_entropy(output2, target2, eps=0.1, reduction="none"))
    ref4 = _reference(output2, target2, eps=0.1, reduction="none")
    assert res4.shape == (N2,)
    assert jnp.allclose(res4, ref4, rtol=1e-5, atol=1e-5), (res4, ref4)

    print("KERNEL_OK")
</pallas_src>

<mosaic_0001>
module attributes {stable_mosaic.version = 11 : i64} {
  func.func @_lsce_partial_kernel(%arg0: i32, %arg1: memref<16x32xf32, #tpu.memory_space<vmem>>, %arg2: memref<16x1xi32, #tpu.memory_space<vmem>>, %arg3: memref<1x8x128xf32, #tpu.memory_space<vmem>>) attributes {dimension_semantics = [#tpu.dimension_semantics<parallel>], iteration_bounds = array<i64: 1>, scalar_prefetch = 0 : i64, scratch_operands = 0 : i64, tpu.core_type = #tpu.core_type<tc>, window_params = [{transform_indices = @transform_0, window_bounds = array<i64: 16, 32>}, {transform_indices = @transform_1, window_bounds = array<i64: 16, 1>}, {transform_indices = @transform_2, window_bounds = array<i64: 1, 8, 128>}]} {
    %c0 = arith.constant 0 : index
    %c0_0 = arith.constant 0 : index
    %0 = vector.load %arg1[%c0, %c0_0] : memref<16x32xf32, #tpu.memory_space<vmem>>, vector<16x32xf32>
    %cst = arith.constant dense<0xFF800000> : vector<16xf32>
    %1 = vector.multi_reduction <maximumf>, %0, %cst [1] : vector<16x32xf32> to vector<16xf32>
    %2 = vector.shape_cast %1 : vector<16xf32> to vector<16x1xf32>
    %3 = vector.broadcast %2 : vector<16x1xf32> to vector<16x32xf32>
    %4 = arith.subf %0, %3 : vector<16x32xf32>
    %5 = math.exp %4 : vector<16x32xf32>
    %cst_1 = arith.constant dense<0.000000e+00> : vector<16xf32>
    %6 = vector.multi_reduction <add>, %5, %cst_1 [1] : vector<16x32xf32> to vector<16xf32>
    %7 = vector.shape_cast %6 : vector<16xf32> to vector<16x1xf32>
    %8 = math.log %7 : vector<16x1xf32>
    %9 = arith.addf %2, %8 : vector<16x1xf32>
    %cst_2 = arith.constant dense<0.000000e+00> : vector<16xf32>
    %10 = vector.multi_reduction <add>, %0, %cst_2 [1] : vector<16x32xf32> to vector<16xf32>
    %11 = vector.shape_cast %10 : vector<16xf32> to vector<16x1xf32>
    %12 = tpu.iota {dimensions = array<i32: 1>} : vector<16x32xi32>
    %c0_3 = arith.constant 0 : index
    %c0_4 = arith.constant 0 : index
    %13 = vector.load %arg2[%c0_3, %c0_4] : memref<16x1xi32, #tpu.memory_space<vmem>>, vector<16x1xi32>
    %14 = vector.broadcast %13 : vector<16x1xi32> to vector<16x32xi32>
    %15 = arith.cmpi eq, %12, %14 : vector<16x32xi32>
    %cst_5 = arith.constant 0.000000e+00 : f32
    %16 = vector.broadcast %cst_5 : f32 to vector<16x32xf32>
    %17 = arith.select %15, %0, %16 : vector<16x32xi1>, vector<16x32xf32>
    %cst_6 = arith.constant dense<0.000000e+00> : vector<16xf32>
    %18 = vector.multi_reduction <add>, %17, %cst_6 [1] : vector<16x32xf32> to vector<16xf32>
    %19 = vector.shape_cast %18 : vector<16xf32> to vector<16x1xf32>
    %cst_7 = arith.constant 3.200000e+01 : f32
    %20 = vector.broadcast %cst_7 : f32 to vector<16x1xf32>
    %21 = arith.mulf %20, %9 : vector<16x1xf32>
    %22 = arith.subf %21, %11 : vector<16x1xf32>
    %23 = arith.subf %9, %19 : vector<16x1xf32>
    %c16_i32 = arith.constant 16 : i32
    %24 = arith.muli %arg0, %c16_i32 : i32
    %25 = tpu.iota {dimensions = array<i32: 0>} : vector<16x1xi32>
    %26 = vector.broadcast %24 : i32 to vector<16x1xi32>
    %27 = arith.addi %26, %25 : vector<16x1xi32>
    %c16_i32_8 = arith.constant 16 : i32
    %28 = vector.broadcast %c16_i32_8 : i32 to vector<16x1xi32>
    %29 = arith.cmpi slt, %27, %28 : vector<16x1xi32>
    %30 = arith.extui %29 : vector<16x1xi1> to vector<16x1xi32>
    %31 = arith.sitofp %30 : vector<16x1xi32> to vector<16x1xf32>
    %32 = arith.mulf %22, %31 : vector<16x1xf32>
    %33 = vector.shape_cast %32 : vector<16x1xf32> to vector<1x16x1xf32>
    %cst_9 = arith.constant dense<0.000000e+00> : vector<1xf32>
    %34 = vector.multi_reduction <add>, %33, %cst_9 [1, 2] : vector<1x16x1xf32> to vector<1xf32>
    %35 = vector.shape_cast %34 : vector<1xf32> to vector<1x1x1xf32>
    %36 = vector.extract %35[0, 0, 0] : f32 from vector<1x1x1xf32>
    %37 = arith.mulf %23, %31 : vector<16x1xf32>
    %38 = vector.shape_cast %37 : vector<16x1xf32> to vector<1x16x1xf32>
    %cst_10 = arith.constant dense<0.000000e+00> : vector<1xf32>
    %39 = vector.multi_reduction <add>, %38, %cst_10 [1, 2] : vector<1x16x1xf32> to vector<1xf32>
    %40 = vector.shape_cast %39 : vector<1xf32> to vector<1x1x1xf32>
    %41 = vector.extract %40[0, 0, 0] : f32 from vector<1x1x1xf32>
    %42 = tpu.iota {dimensions = array<i32: 1>} : vector<1x8x128xi32>
    %43 = tpu.iota {dimensions = array<i32: 2>} : vector<1x8x128xi32>
    %c0_i32 = arith.constant 0 : i32
    %44 = vector.broadcast %c0_i32 : i32 to vector<1x8x128xi32>
    %45 = arith.cmpi eq, %42, %44 : vector<1x8x128xi32>
    %c0_i32_11 = arith.constant 0 : i32
    %46 = vector.broadcast %c0_i32_11 : i32 to vector<1x8x128xi32>
    %47 = arith.cmpi eq, %43, %46 : vector<1x8x128xi32>
    %48 = arith.andi %45, %47 : vector<1x8x128xi1>
    %c0_i32_12 = arith.constant 0 : i32
    %49 = vector.broadcast %c0_i32_12 : i32 to vector<1x8x128xi32>
    %50 = arith.cmpi eq, %42, %49 : vector<1x8x128xi32>
    %c1_i32 = arith.constant 1 : i32
    %51 = vector.broadcast %c1_i32 : i32 to vector<1x8x128xi32>
    %52 = arith.cmpi eq, %43, %51 : vector<1x8x128xi32>
    %53 = arith.andi %50, %52 : vector<1x8x128xi1>
    %cst_13 = arith.constant 0.000000e+00 : f32
    %54 = vector.broadcast %41 : f32 to vector<1x8x128xf32>
    %55 = vector.broadcast %cst_13 : f32 to vector<1x8x128xf32>
    %56 = arith.select %53, %54, %55 : vector<1x8x128xi1>, vector<1x8x128xf32>
    %57 = vector.broadcast %36 : f32 to vector<1x8x128xf32>
    %58 = arith.select %48, %57, %56 : vector<1x8x128xi1>, vector<1x8x128xf32>
    %c0_14 = arith.constant 0 : index
    %c0_15 = arith.constant 0 : index
    %c0_16 = arith.constant 0 : index
    %59 = vector.load %arg3[%c0_14, %c0_15, %c0_16] : memref<1x8x128xf32, #tpu.memory_space<vmem>>, vector<1x8x128xf32>
    tpu.vector_store %arg3[%c0_14, %c0_15, %c0_16], %58 {strides = array<i32>} : memref<1x8x128xf32, #tpu.memory_space<vmem>>, vector<1x8x128xf32>,
    return
  }
  func.func @transform_0(%arg0: i32) -> (i32, i32) {
    %c0_i32 = arith.constant 0 : i32
    %c0_i32_0 = arith.constant 0 : i32
    return %arg0, %c0_i32 : i32, i32
  }
  func.func @transform_1(%arg0: i32) -> (i32, i32) {
    %c0_i32 = arith.constant 0 : i32
    %c0_i32_0 = arith.constant 0 : i32
    return %arg0, %c0_i32 : i32, i32
  }
  func.func @transform_2(%arg0: i32) -> (i32, i32, i32) {
    %c0_i32 = arith.constant 0 : i32
    %c0_i32_0 = arith.constant 0 : i32
    %c0_i32_1 = arith.constant 0 : i32
    return %arg0, %c0_i32, %c0_i32_0 : i32, i32, i32
  }
}

</mosaic_0001>

<bundles_post_ra>
// kernel: _lsce_impl.1
= control target key start
LH: loop header
LB: loop body
LE: loop exit
PB: predicated region body
PF: predicated region fallthrough
CT: control target
= control target key end

     0   :  { %vm13_vm0 = vcmask 261120   ;;  %v141_v2 = vmov 0   ;;  %v44_v13 = vlaneseq  ;;  %vm85_vm3 = vcmask 7168   ;;  %s188_s0 = inlined_call_operand.vmem [shape: f32[16,32], index: 0, kind: input, shape index: {}]   ;;  %s189_s1 = inlined_call_operand.vmem [shape: s32[16,1], index: 1, kind: input, shape index: {}]   ;;  %s190_s2 = inlined_call_operand.vmem [shape: f32[1,8,128], index: 2, kind: output, shape index: {}]  }
   0x1   :  { %v11_v0 = vld [vmem:[%s188_s0] sm:$0xff]  ;;  %v12_v1 = vld [vmem:[%s188_s0 + $0x8] sm:$0xff]  ;;  %131 = vset.pattern.permute.xlu1 %v141_v2  ;;  %132 = vset.pattern.permute.xlu0 %v141_v2 }
   0x2   :  { %v46_v3 = vld [vmem:[%s189_s1] sm:$0xff]  ;;  %v14_v4 = vsel %vm13_vm0, %v11_v0, -inf  ;;  %v47_v5 = vld [vmem:[%s189_s1 + $0x8] sm:$0xff]  ;;  %v17_v6 = vsel %vm13_vm0, %v12_v1, -inf  ;;  %v173_v17 = vand.u32 127, %v44_v13  ;;  %v38_v18 = vsel %vm13_vm0, %v11_v0, 0.0 }
   0x3   :  { %49 = vperm.xlu1 %131, %v46_v3   ;;  %15 = vmax.xlane.f32.xlu0 %v14_v4  ;;  %v41_v22 = vsel %vm13_vm0, %v12_v1, 0.0 }
   0x4   :  { %vm115_vm5 = vcmp.eq.s32.totalorder %v173_v17, 1  ;;  %vm113_vm6 = vcmp.eq.s32.totalorder %v173_v17, 0 }
   0x7   :  { %52 = vperm.xlu1 %131, %v47_v5   ;;  %18 = vmax.xlane.f32.xlu0 %v17_v6 }
  0x7e   :  { %v50_v15 = vpop.permute.xlu1 %49 }
  0x7f   :  { %vm54_vm1 = vcmp.eq.s32.totalorder %v173_v17, %v50_v15 }
  0x80   :  { %v56_v23 = vsel %vm54_vm1, %v11_v0, 0.0 }
  0x81   :  { %v58_v24 = vsel %vm13_vm0, %v56_v23, 0.0 }
  0x82   :  { %v53_v21 = vpop.permute.xlu1 %52 }
  0x83   :  { %vm55_vm2 = vcmp.eq.s32.totalorder %v173_v17, %v53_v21 }
  0x84   :  { %v57_v25 = vsel %vm55_vm2, %v12_v1, 0.0 }
  0x85   :  { %v61_v26 = vsel %vm13_vm0, %v57_v25, 0.0 }
  0x8c   :  { %v16_v7 = vpop.xlane.xlu0 %15 }
  0x8d   :  { %v20_v8 = vsub.f32 %v11_v0, %v16_v7 }
  0x8f   :  { %v22_v9 = vmul.f32 1.442695, %v20_v8 }
  0x90   :  { %v19_v10 = vpop.xlane.xlu0 %18 }
  0x91   :  { %133 = vpow2.f32 %v22_v9  ;;  %v21_v11 = vsub.f32 %v12_v1, %v19_v10  ;;  %v72_v1 = vshrl.u32 %v44_v13, 7 }
  0x93   :  { %v24_v12 = vmul.f32 1.442695, %v21_v11  ;;  %vm112_vm4 = vcmp.eq.s32.totalorder %v72_v1, 0 }
  0x94   :  { %vm116_vm7 = vmand %vm112_vm4, %vm115_vm5 }
  0x95   :  { %135 = vpow2.f32 %v24_v12  ;;  %vm114_vm8 = vmand %vm112_vm4, %vm113_vm6 }
  0x9e   :  { %v134_v14 = vpop.eup %133 }
  0x9f   :  { %v26_v16 = vsel %vm13_vm0, %v134_v14, 0.0 }
  0xa0   :  { %27 = vadd.xlane.f32.xlu0 %v26_v16 }
  0xa2   :  { %v136_v19 = vpop.eup %135 }
  0xa3   :  { %v29_v20 = vsel %vm13_vm0, %v136_v19, 0.0 }
  0xa4   :  { %30 = vadd.xlane.f32.xlu1 %v29_v20  ;;  %39 = vadd.xlane.f32.xlu0 %v38_v18 }
  0xa8   :  { %42 = vadd.xlane.f32.xlu0 %v41_v22 }
  0xac   :  { %59 = vadd.xlane.f32.xlu0 %v58_v24 }
  0xb0   :  { %62 = vadd.xlane.f32.xlu0 %v61_v26 }
 0x129   :  { %v28_v27 = vpop.xlane.xlu0 %27 }
 0x12a   :  { %137 = vlog2.f32 %v28_v27 }
 0x12d   :  { %v31_v28 = vpop.xlane.xlu1 %30  ;;  %v40_v29 = vpop.xlane.xlu0 %39 }
 0x12e   :  { %139 = vlog2.f32 %v31_v28 }
 0x131   :  { %v43_v30 = vpop.xlane.xlu0 %42 }
 0x135   :  { %v60_v33 = vpop.xlane.xlu0 %59 }
 0x137   :  { %v138_v31 = vpop.eup %137 }
 0x138   :  { %v33_v32 = vmul.f32 0.6931472, %v138_v31 }
 0x139   :  { %v63_v39 = vpop.xlane.xlu0 %62 }
 0x13a   :  { %v36_v34 = vadd.f32 %v33_v32, %v16_v7 }
 0x13b   :  { %v140_v35 = vpop.eup %139 }
 0x13c   :  { %v35_v36 = vmul.f32 0.6931472, %v140_v35  ;;  %v64_v37 = vmul.f32 32.0, %v36_v34  ;;  %v68_v44 = vsub.f32 %v36_v34, %v60_v33 }
 0x13e   :  { %v37_v38 = vadd.f32 %v35_v36, %v19_v10  ;;  %v66_v40 = vsub.f32 %v64_v37, %v40_v29  ;;  %v100_v49 = vsel %vm85_vm3, %v68_v44, 0.0 }
 0x140   :  { %v65_v41 = vmul.f32 32.0, %v37_v38  ;;  %v69_v43 = vsub.f32 %v37_v38, %v63_v39  ;;  %v86_v45 = vsel %vm85_vm3, %v66_v40, 0.0 }
 0x142   :  { %v67_v42 = vsub.f32 %v65_v41, %v43_v30  ;;  %v101_v48 = vsel %vm85_vm3, %v69_v43, 0.0 }
 0x143   :  { %v102_v50 = vadd.f32 %v101_v48, %v100_v49 }
 0x144   :  { %v87_v46 = vsel %vm85_vm3, %v67_v42, 0.0 }
 0x145   :  { %v88_v47 = vadd.f32 %v87_v46, %v86_v45 }
 0x147   :  { %89 = vadd.xlane.f32.xlu0 %v88_v47 }
 0x14b   :  { %103 = vadd.xlane.f32.xlu0 %v102_v50 }
 0x1d0   :  { %v90_v51 = vpop.xlane.xlu0 %89 }
 0x1d1   :  { %v91_v52 = vrot.slane %v90_v51, 4 }
 0x1d3   :  { %v92_v53 = vadd.f32 %v91_v52, %v90_v51 }
 0x1d4   :  { %v104_v54 = vpop.xlane.xlu0 %103 }
 0x1d5   :  { %v93_v55 = vrot.slane %v92_v53, 2  ;;  %v105_v56 = vrot.slane %v104_v54, 4 }
 0x1d7   :  { %v106_v57 = vadd.f32 %v105_v56, %v104_v54  ;;  %v94_v58 = vadd.f32 %v93_v55, %v92_v53 }
 0x1d9   :  { %v107_v59 = vrot.slane %v106_v57, 2  ;;  %v95_v60 = vrot.slane %v94_v58, 1 }
 0x1db   :  { %v108_v61 = vadd.f32 %v107_v59, %v106_v57  ;;  %v96_v62 = vadd.f32 %v95_v60, %v94_v58 }
 0x1dd   :  { %126 = vpush %v96_v62  ;;  %v109_v63 = vrot.slane %v108_v61, 1 }
 0x1df   :  { %v110_v0 = vadd.f32 %v109_v63, %v108_v61 }
 0x1e1   :  { %128 = vpush %v110_v0 }
 0x20e   :  { %s127_s0 = spop %126 }
 0x20f   :  { %v119_v3 = vstv %s127_s0 }
 0x212   :  { %s129_s1 = spop %128 }
 0x213   :  { %v117_v2 = vstv %s129_s1 }
 0x214   :  { %v118_v4 = vsel %vm116_vm7, %v117_v2, 0.0 }
 0x215   :  { %v120_v5 = vsel %vm114_vm8, %v119_v3, %v118_v4 }
 0x216   :  { %121 = vst [vmem:[%s190_s2] sm:$0xff] %v120_v5 }

</bundles_post_ra>
